<compile_context>
chip_gen: v5e
topology: v5e:2x2
jax: 0.10.0
libtpu: 0.0.40
codegen_flags: <defaults>
</compile_context>

<pallas_src>
import functools

import jax
import jax.numpy as jnp
from jax.experimental import pallas as pl
from jax.experimental.pallas import tpu as pltpu


def _num_tensorcores():
    """Best-effort TensorCore count of the local device.

    Returns 1 on single-TC parts (v5e/v6e) or when it cannot be determined,
    2 on 2-TC parts (v7x) so the batch can be split across both cores.
    """
    try:
        info = pltpu.get_tpu_info()
        for name in ("num_cores", "core_count", "num_tensorcores",
                     "tensor_core_count"):
            v = getattr(info, name, None)
            if isinstance(v, int) and 1 <= v <= 8:
                return v
    except Exception:
        pass
    try:
        kind = jax.devices()[0].device_kind.lower()
        if "v7" in kind:
            return 2
    except Exception:
        pass
    return 1


def _nll_partial_kernel(acc_h, n_cmp, x_ref, g_ref, out_ref):
    """Accumulate per-lane partial sums of gathered log-probs.

    x_ref:   (tile_rows, W) f32 -- k packed samples per lane-row.
    g_ref:   map mode (n_cmp == 0):  (tile_rows, W) lane-replicated column map
                                     (value = s*C + target, sentinel -1).
             compare mode (n_cmp=k): (tile_rows, k) per-slot target columns
                                     (s*C pre-added, sentinel -1).
             Sentinel rows select nothing, which covers the padded tail of the
             last tile and the clamped duplicate tiles of an uneven split.
    out_ref: (acc_h, W) f32 accumulator block, revisited along the inner axis.
    """
    @pl.when(pl.program_id(1) == 0)
    def _init():
        out_ref[...] = jnp.zeros_like(out_ref)

    x = x_ref[...]
    tile_rows, W = x.shape
    col = jax.lax.broadcasted_iota(jnp.int32, (tile_rows, W), 1)
    g = g_ref[...].astype(jnp.int32)

    if n_cmp == 0:
        mask = col == g                                   # one compare per vreg
    else:
        mask = col == g[:, 0:1]
        for s in range(1, n_cmp):
            mask = jnp.logical_or(mask, col == g[:, s:s + 1])

    picked = jnp.where(mask, x, jnp.float32(0.0))
    # acc_h (=32 when the tile allows) independent sublane strips keep the
    # per-lane accumulation from forming one long serial add chain.
    out_ref[...] += picked.reshape(-1, acc_h, W).sum(axis=0)


def _nll_sum_pallas(x_main, t_main, R, k, C, *, max_tile_rows=None):
    """Sum of log p[i, target[i]] over the first R*k samples via Pallas."""
    W = k * C
    x_packed = x_main.reshape(R, W)        # free row-major metadata reshape
    use_map = k >= 8                        # small C: lane-replicated column map

    max_col = W - 1
    if max_col <= 127:
        tgt_dtype = jnp.int8
    elif max_col <= 32767:
        tgt_dtype = jnp.int16
    else:
        tgt_dtype = jnp.int32

    # Per-slot target column with the s*C offset pre-added in the wrapper.
    col_vals = (t_main.reshape(R, k)
                + jnp.arange(k, dtype=jnp.int32)[None, :] * C)       # (R, k)
    if use_map:
        gather = jnp.repeat(col_vals, C, axis=1).astype(tgt_dtype)   # (R, W)
    else:
        gather = col_vals.astype(tgt_dtype)                          # (R, k)
    g_width = gather.shape[1]
    g_itemsize = jnp.dtype(tgt_dtype).itemsize

    # ---- tile sizing: big streaming blocks, budgeted from real usage -------
    lanes_x = -(-W // 128) * 128
    lanes_g = -(-g_width // 128) * 128
    bytes_per_row = lanes_x * 4 + lanes_g * g_itemsize
    try:
        vmem_cap = int(pltpu.get_tpu_info().vmem_capacity_bytes)
    except Exception:
        vmem_cap = 64 * 1024 * 1024                      # conservative fallback
    budget = min(vmem_cap // 2, 40 * 1024 * 1024)        # double-buffered blocks
    cap_rows = max(32, budget // (2 * bytes_per_row))
    want_rows = max(32, (8 * 1024 * 1024) // (lanes_x * 4))   # ~8 MiB payload/step
    r_up = -(-R // 8) * 8 if R < 32 else -(-R // 32) * 32
    tile_rows = min(cap_rows, want_rows, r_up)
    if max_tile_rows is not None:                        # test knob (floor of 32)
        tile_rows = min(tile_rows, max(max_tile_rows, 32 if R >= 32 else 8))
    if tile_rows >= 32:
        tile_rows = (tile_rows // 32) * 32
        acc_h = 32
    else:
        tile_rows = max(8, (tile_rows // 8) * 8)
        acc_h = 8

    steps_total = -(-R // tile_rows)
    n_cores = _num_tensorcores()
    n_split_pref = n_cores if (n_cores > 1 and steps_total >= n_cores) else 1

    kernel = functools.partial(_nll_partial_kernel, acc_h, 0 if use_map else k)

    def run(n_split, split_sem):
        S = -(-steps_total // n_split)
        cover_rows = n_split * S * tile_rows
        # Sentinel rows (-1 never matches a column index) cover the padded
        # tail of the last real tile and any clamped duplicate tiles; the
        # pad is on the small int8/int16 operand only (input stays untouched).
        g_pad = jnp.pad(gather, ((0, cover_rows - R), (0, 0)),
                        constant_values=-1)

        def x_idx(c, j):
            # Clamp: duplicate tiles of an uneven split re-read the last real
            # block; their gather rows are sentinel so they contribute nothing.
            return (jnp.minimum(c * S + j, steps_total - 1), 0)

        def g_idx(c, j):
            return (c * S + j, 0)

        usage = (2 * tile_rows * bytes_per_row
                 + 2 * n_split * acc_h * lanes_x * 4)
        vmem_limit = int(min(max(16 * 1024 * 1024, usage * 5 // 4),
                             vmem_cap * 3 // 4))

        partials = pl.pallas_call(
            kernel,
            out_shape=jax.ShapeDtypeStruct((n_split * acc_h, W), jnp.float32),
            grid_spec=pltpu.PrefetchScalarGridSpec(
                num_scalar_prefetch=0,
                grid=(n_split, S),
                in_specs=[
                    pl.BlockSpec((tile_rows, W), x_idx),        # packed log-probs
                    pl.BlockSpec((tile_rows, g_width), g_idx),  # int8 gather map
                ],
                out_specs=pl.BlockSpec((acc_h, W), lambda c, j: (c, 0)),
            ),
            compiler_params=pltpu.CompilerParams(
                dimension_semantics=(split_sem, pltpu.ARBITRARY),
                vmem_limit_bytes=vmem_limit,
            ),
        )(x_packed, g_pad)
        return jnp.sum(partials)

    if n_split_pref > 1:
        try:
            # v7x: shard the streaming steps across both TensorCores.
            return run(n_split_pref, pltpu.CORE_PARALLEL)
        except Exception:
            pass   # fall back to the single-core schedule below
    return run(1, pltpu.ARBITRARY)


def elbo_forward(inp, target, kl, beta, *, train_size, max_tile_rows=None):
    """Pallas ELBO forward: returns (total_loss, nll_loss, kl_loss).

    inp:    (N, C) f32 log-probabilities (output of log_softmax)
    target: (N,)   integer class indices
    kl, beta: scalars
    """
    N, C = inp.shape
    x = inp.astype(jnp.float32)
    t = target.astype(jnp.int32)

    k = max(1, 128 // C)      # packed samples per lane-row (map mode keeps the
    R = N // k                # in-kernel compute O(1) in k, so no cap needed)
    rem = N - R * k

    if R == 0:
        # Batch smaller than one packed row: trivial pure-XLA path.
        picked = jnp.take_along_axis(x, t[:, None], axis=1)
        main_sum = jnp.sum(picked)
    else:
        x_main = x if rem == 0 else x[: R * k]
        t_main = t if rem == 0 else t[: R * k]
        main_sum = _nll_sum_pallas(x_main, t_main, R, k, C,
                                   max_tile_rows=max_tile_rows)
        if rem:
            # < k tail samples: tiny XLA gather, added to the kernel's sum.
            tail = jnp.take_along_axis(x[R * k:], t[R * k:, None], axis=1)
            main_sum = main_sum + jnp.sum(tail)

    nll = -main_sum / jnp.float32(N) * jnp.asarray(train_size, jnp.float32)
    kl_loss = jnp.asarray(beta, jnp.float32) * jnp.asarray(kl, jnp.float32)
    total = nll + kl_loss
    return total, nll, kl_loss


def elbo_ref(inp, target, kl, beta, *, train_size):
    # Pure-JAX reference of F.nll_loss(input, target, 'mean') * train_size + beta*kl.
    picked = jnp.take_along_axis(inp, target.reshape(-1, 1), axis=1)[:, 0]
    nll = -jnp.mean(picked) * train_size
    kl_loss = beta * kl
    return nll + kl_loss, nll, kl_loss


def _check(name, got, want, rtol=1e-4, atol=1e-3):
    for g, w in zip(got, want):
        assert jnp.allclose(g, w, rtol=rtol, atol=atol), (name, g, w)


if __name__ == "__main__":
    key = jax.random.PRNGKey(0)
    train_size = 60000.0

    # (N, C, max_tile_rows) -- small shapes:
    #   case0: compare mode (k=4), single step
    #   case1: map mode (k=12, W=120), single step + XLA tail (rem=4)
    #   case2: map mode, forced small tiles -> multi-step accumulation,
    #          partial last tile (sentinel rows) + tail (rem=8)
    #   case3: tiny batch (R=2 < 8): full-dim blocks
    cases = [
        (512, 32, None),
        (256, 10, None),
        (2000, 10, 64),
        (24, 10, None),
    ]
    for idx, (N, C, mtr) in enumerate(cases):
        k1, k2, k3, key = jax.random.split(key, 4)
        logits = jax.random.normal(k1, (N, C), dtype=jnp.float32)
        log_probs = jax.nn.log_softmax(logits, axis=-1)   # NLL expects log-probs
        target = jax.random.randint(k2, (N,), 0, C, dtype=jnp.int32)
        kl = jax.random.uniform(k3, (), dtype=jnp.float32) * 10.0
        beta = jnp.float32(0.1)

        got = elbo_forward(log_probs, target, kl, beta,
                           train_size=train_size, max_tile_rows=mtr)
        jax.block_until_ready(got)
        want = elbo_ref(log_probs, target, kl, beta, train_size=train_size)
        _check(f"case{idx}", got, want)

    print("KERNEL_OK")
</pallas_src>

<mosaic_0001>
module attributes {stable_mosaic.version = 11 : i64} {
  func.func @_nll_partial_kernel(%arg0: i32, %arg1: i32, %arg2: memref<128x128xf32, #tpu.memory_space<vmem>>, %arg3: memref<128x4xi8, #tpu.memory_space<vmem>>, %arg4: memref<32x128xf32, #tpu.memory_space<vmem>>) attributes {dimension_semantics = [#tpu.dimension_semantics<arbitrary>, #tpu.dimension_semantics<arbitrary>], iteration_bounds = array<i64: 1, 1>, scalar_prefetch = 0 : i64, scratch_operands = 0 : i64, tpu.core_type = #tpu.core_type<tc>, window_params = [{transform_indices = @transform_0, window_bounds = array<i64: 128, 128>}, {transform_indices = @transform_1, window_bounds = array<i64: 128, 4>}, {transform_indices = @transform_2, window_bounds = array<i64: 32, 128>}]} {
    %c0_i32 = arith.constant 0 : i32
    %0 = arith.cmpi eq, %arg1, %c0_i32 : i32
    %1 = arith.extui %0 : i1 to i32
    %c0_i32_0 = arith.constant 0 : i32
    %2 = arith.cmpi ne, %1, %c0_i32_0 : i32
    scf.if %2 {
      %cst_9 = arith.constant 0.000000e+00 : f32
      %29 = vector.broadcast %cst_9 : f32 to vector<32x128xf32>
      %c0_10 = arith.constant 0 : index
      %c0_11 = arith.constant 0 : index
      %30 = vector.load %arg4[%c0_10, %c0_11] : memref<32x128xf32, #tpu.memory_space<vmem>>, vector<32x128xf32>
      tpu.vector_store %arg4[%c0_10, %c0_11], %29 {strides = array<i32>} : memref<32x128xf32, #tpu.memory_space<vmem>>, vector<32x128xf32>,
    } else {
    }
    %c0 = arith.constant 0 : index
    %c0_1 = arith.constant 0 : index
    %3 = vector.load %arg2[%c0, %c0_1] : memref<128x128xf32, #tpu.memory_space<vmem>>, vector<128x128xf32>
    %4 = tpu.iota {dimensions = array<i32: 1>} : vector<128x128xi32>
    %c0_2 = arith.constant 0 : index
    %c0_3 = arith.constant 0 : index
    %5 = vector.load %arg3[%c0_2, %c0_3] : memref<128x4xi8, #tpu.memory_space<vmem>>, vector<128x4xi8>
    %6 = arith.extsi %5 : vector<128x4xi8> to vector<128x4xi32>
    %7 = vector.extract_strided_slice %6 {offsets = [0, 0], sizes = [128, 1], strides = [1, 1]} : vector<128x4xi32> to vector<128x1xi32>
    %8 = vector.broadcast %7 : vector<128x1xi32> to vector<128x128xi32>
    %9 = arith.cmpi eq, %4, %8 : vector<128x128xi32>
    %10 = vector.extract_strided_slice %6 {offsets = [0, 1], sizes = [128, 1], strides = [1, 1]} : vector<128x4xi32> to vector<128x1xi32>
    %11 = vector.broadcast %10 : vector<128x1xi32> to vector<128x128xi32>
    %12 = arith.cmpi eq, %4, %11 : vector<128x128xi32>
    %13 = arith.ori %9, %12 : vector<128x128xi1>
    %14 = vector.extract_strided_slice %6 {offsets = [0, 2], sizes = [128, 1], strides = [1, 1]} : vector<128x4xi32> to vector<128x1xi32>
    %15 = vector.broadcast %14 : vector<128x1xi32> to vector<128x128xi32>
    %16 = arith.cmpi eq, %4, %15 : vector<128x128xi32>
    %17 = arith.ori %13, %16 : vector<128x128xi1>
    %18 = vector.extract_strided_slice %6 {offsets = [0, 3], sizes = [128, 1], strides = [1, 1]} : vector<128x4xi32> to vector<128x1xi32>
    %19 = vector.broadcast %18 : vector<128x1xi32> to vector<128x128xi32>
    %20 = arith.cmpi eq, %4, %19 : vector<128x128xi32>
    %21 = arith.ori %17, %20 : vector<128x128xi1>
    %cst = arith.constant 0.000000e+00 : f32
    %22 = vector.broadcast %cst : f32 to vector<128x128xf32>
    %23 = arith.select %21, %3, %22 : vector<128x128xi1>, vector<128x128xf32>
    %c0_4 = arith.constant 0 : index
    %c0_5 = arith.constant 0 : index
    %24 = vector.load %arg4[%c0_4, %c0_5] : memref<32x128xf32, #tpu.memory_space<vmem>>, vector<32x128xf32>
    %25 = vector.shape_cast %23 : vector<128x128xf32> to vector<4x32x128xf32>
    %cst_6 = arith.constant dense<0.000000e+00> : vector<32x128xf32>
    %26 = vector.multi_reduction <add>, %25, %cst_6 [0] : vector<4x32x128xf32> to vector<32x128xf32>
    %27 = arith.addf %24, %26 : vector<32x128xf32>
    %c0_7 = arith.constant 0 : index
    %c0_8 = arith.constant 0 : index
    %28 = vector.load %arg4[%c0_7, %c0_8] : memref<32x128xf32, #tpu.memory_space<vmem>>, vector<32x128xf32>
    tpu.vector_store %arg4[%c0_7, %c0_8], %27 {strides = array<i32>} : memref<32x128xf32, #tpu.memory_space<vmem>>, vector<32x128xf32>,
    return
  }
  func.func @transform_0(%arg0: i32, %arg1: i32) -> (i32, i32) {
    %c1_i32 = arith.constant 1 : i32
    %0 = arith.muli %arg0, %c1_i32 : i32
    %1 = arith.addi %0, %arg1 : i32
    %c0_i32 = arith.constant 0 : i32
    %2 = arith.minsi %1, %c0_i32 : i32
    %c0_i32_0 = arith.constant 0 : i32
    %c0_i32_1 = arith.constant 0 : i32
    return %2, %c0_i32_0 : i32, i32
  }
  func.func @transform_1(%arg0: i32, %arg1: i32) -> (i32, i32) {
    %c1_i32 = arith.constant 1 : i32
    %0 = arith.muli %arg0, %c1_i32 : i32
    %1 = arith.addi %0, %arg1 : i32
    %c0_i32 = arith.constant 0 : i32
    %c0_i32_0 = arith.constant 0 : i32
    return %1, %c0_i32 : i32, i32
  }
  func.func @transform_2(%arg0: i32, %arg1: i32) -> (i32, i32) {
    %c0_i32 = arith.constant 0 : i32
    %c0_i32_0 = arith.constant 0 : i32
    return %arg0, %c0_i32 : i32, i32
  }
}

</mosaic_0001>

<bundles_post_ra>
// kernel: tpu_custom_call.1
= control target key start
LH: loop header
LB: loop body
LE: loop exit
PB: predicated region body
PF: predicated region fallthrough
CT: control target
= control target key end

     0   :  { %7 = vsyncpa [#allocation3], 0  ;;  %s1017_s0 = inlined_call_operand.hbm [shape: f32[128,128], index: 0, kind: input, shape index: {}]   ;;  %s1018_s1 = inlined_call_operand.vmem [shape: s8[128,4], index: 1, kind: input, shape index: {}]   ;;  %s1019_s2 = inlined_call_operand.hbm [shape: f32[32,128], index: 2, kind: output, shape index: {}]  }
   0x1   :  { %8 = vsyncpa [#allocation4], 0  ;;  %s19_s11 = sshll.u32 %s1017_s0, 4  ;;  %s601_s12 = smov [#allocation2]   ;;  %s20_s11 = int_to_ptr.hbm [resolvable:$true] %s19_s11 }
   0x2   :  { %s21_s13 = sshll.u32 %s601_s12, 4  ;;  %s602_s14 = smov 128   ;;  %s22_s13 = int_to_ptr.vmem [resolvable:$true] %s21_s13 }
   0x3   :  { %s603_s15 = smov 8  }
   0x4   :  { %27 = dma.hbm_to_vmem [thread:$0]  %s20_s11, 2048, %s22_s13, [#allocation3], %s602_s14, %s602_s14, %s603_s15  }
   0x5   :  { %597 = dma.done.wait [#allocation3], 2048  }
   0x6   :  { %598 = vsyncadd [#allocation3], 4294965248  ;;  %v604_v0 = vmov 0   ;;  %v522_v1 = vld [vmem:[%s1018_s1 + $0x8] sm:$0xff]   ;;  %v521_v2 = vld [vmem:[%s1018_s1] sm:$0xff]   ;;  %v605_v21 = vmov 1   ;;  %v84_v33 = vlaneseq }
   0x7   :  { %539 = vset.pattern.permute.xlu2 %v604_v0  ;;  %538 = vset.pattern.permute.xlu1 %v604_v0  ;;  %v636_v3 = vunpack.c.0.s8 %v522_v1  ;;  %v638_v4 = vunpack.c.2.s8 %v521_v2  ;;  %v640_v5 = vunpack.c.0.s8 %v521_v2  ;;  %v645_v6 = vunpack.c.1.s8 %v522_v1  ;;  %v524_v9 = vld [vmem:[%s1018_s1 + $0x10] sm:$0xff]   ;;  %v527_v16 = vld [vmem:[%s1018_s1 + $0x18] sm:$0xff]   ;;  %v76_v62 = vld [vmem:[#allocation2 + $0x40] sm:$0xff]  ;;  %s608_s1 = smov [#allocation5]   ;;  %s468_s26 = sshll.u32 %s1019_s2, 4  ;;  %s469_s26 = int_to_ptr.hbm [resolvable:$true] %s468_s26 }
   0x8   :  { %537 = vset.pattern.permute.xlu0 %v604_v0  ;;  %v647_v7 = vunpack.c.3.s8 %v521_v2  ;;  %v649_v8 = vunpack.c.1.s8 %v521_v2  ;;  %v657_v10 = vunpack.c.0.s8 %v524_v9  ;;  %v659_v11 = vunpack.c.3.s8 %v522_v1  ;;  %s466_s23 = sshll.u32 %s608_s1, 4  ;;  %s467_s23 = int_to_ptr.vmem [resolvable:$true] %s466_s23 }
   0x9   :  { %131 = vperm.xlu2 %539, %v636_v3   ;;  %125 = vperm.xlu1 %538, %v638_v4   ;;  %v661_v12 = vunpack.c.2.s8 %v522_v1  ;;  %v666_v13 = vunpack.c.3.s8 %v524_v9  ;;  %v668_v14 = vunpack.c.2.s8 %v524_v9  ;;  %v670_v15 = vunpack.c.1.s8 %v524_v9  ;;  %v79_v9 = vld [vmem:[#allocation2 + $0x58] sm:$0xff] }
   0xa   :  { %119 = vperm.xlu0 %537, %v640_v5   ;;  %v678_v17 = vunpack.c.2.s8 %v527_v16  ;;  %v680_v18 = vunpack.c.1.s8 %v527_v16  ;;  %v682_v19 = vunpack.c.0.s8 %v527_v16  ;;  %v687_v20 = vunpack.c.3.s8 %v527_v16 }
   0xb   :  { %v606_v22 = vmov 2   ;;  %v607_v31 = vmov 3   ;;  %v732_v34 = vand.u32 127, %v84_v33  ;;  %v1030_v55 = vmov 0  ;;  %v69_v33 = vld [vmem:[#allocation2 + $0x8] sm:$0xff] }
   0xc   :  { %v1032_v56 = vmov 0  ;;  %v1036_v61 = vmov 0  ;;  %v1040_v63 = vmov 0 }
  0x11   :  { %134 = vperm.xlu2 %539, %v645_v6   ;;  %128 = vperm.xlu1 %538, %v647_v7  }
  0x12   :  { %122 = vperm.xlu0 %537, %v649_v8  }
  0x19   :  { %143 = vperm.xlu2 %539, %v657_v10   ;;  %140 = vperm.xlu1 %538, %v659_v11  }
  0x1a   :  { %137 = vperm.xlu0 %537, %v661_v12  }
  0x21   :  { %152 = vperm.xlu2 %539, %v666_v13   ;;  %149 = vperm.xlu1 %538, %v668_v14  }
  0x22   :  { %146 = vperm.xlu0 %537, %v670_v15  }
  0x29   :  { %161 = vperm.xlu2 %539, %v678_v17   ;;  %158 = vperm.xlu1 %538, %v680_v18  }
  0x2a   :  { %155 = vperm.xlu0 %537, %v682_v19  }
  0x31   :  { %541 = vset.pattern.permute.xlu2 %v605_v21  ;;  %540 = vset.pattern.permute.xlu1 %v605_v21 }
  0x32   :  { %164 = vperm.xlu0 %537, %v687_v20   ;;  %186 = vperm.xlu2 %541, %v649_v8  }
  0x33   :  { %183 = vperm.xlu1 %540, %v640_v5  }
  0x3a   :  { %542 = vset.pattern.permute.xlu0 %v605_v21  ;;  %195 = vperm.xlu2 %541, %v636_v3  }
  0x3b   :  { %192 = vperm.xlu1 %540, %v647_v7   ;;  %189 = vperm.xlu0 %542, %v638_v4  }
  0x42   :  { %201 = vperm.xlu2 %541, %v661_v12  }
  0x43   :  { %198 = vperm.xlu1 %540, %v645_v6   ;;  %204 = vperm.xlu0 %542, %v659_v11  }
  0x4a   :  { %210 = vperm.xlu2 %541, %v670_v15  }
  0x4b   :  { %207 = vperm.xlu1 %540, %v657_v10   ;;  %213 = vperm.xlu0 %542, %v668_v14  }
  0x52   :  { %219 = vperm.xlu2 %541, %v682_v19  }
  0x53   :  { %216 = vperm.xlu1 %540, %v666_v13   ;;  %222 = vperm.xlu0 %542, %v680_v18  }
  0x5a   :  { %228 = vperm.xlu2 %541, %v687_v20  }
  0x5b   :  { %225 = vperm.xlu1 %540, %v678_v17   ;;  %543 = vset.pattern.permute.xlu0 %v606_v22 }
  0x5c   :  { %263 = vperm.xlu0 %543, %v640_v5  }
  0x62   :  { %545 = vset.pattern.permute.xlu2 %v606_v22 }
  0x63   :  { %544 = vset.pattern.permute.xlu1 %v606_v22  ;;  %v132_v23 = vpop.permute.xlu2 %131  ;;  %269 = vperm.xlu2 %545, %v638_v4  }
  0x64   :  { %266 = vperm.xlu1 %544, %v649_v8   ;;  %278 = vperm.xlu0 %543, %v645_v6   ;;  %vm170_vm3 = vcmp.eq.s32.totalorder %v732_v34, %v132_v23 }
  0x6b   :  { %v710_v24 = vpop.permute.xlu2 %134  ;;  %275 = vperm.xlu2 %545, %v636_v3  }
  0x6c   :  { %272 = vperm.xlu1 %544, %v647_v7   ;;  %287 = vperm.xlu0 %543, %v657_v10  }
  0x73   :  { %v715_v25 = vpop.permute.xlu2 %143  ;;  %284 = vperm.xlu2 %545, %v659_v11  }
  0x74   :  { %281 = vperm.xlu1 %544, %v661_v12   ;;  %296 = vperm.xlu0 %543, %v666_v13  }
  0x7b   :  { %v720_v26 = vpop.permute.xlu2 %152  ;;  %v722_v27 = vpop.permute.xlu1 %125  ;;  %293 = vperm.xlu2 %545, %v668_v14  }
  0x7c   :  { %290 = vperm.xlu1 %544, %v670_v15   ;;  %305 = vperm.xlu0 %543, %v678_v17   ;;  %v120_v28 = vpop.permute.xlu0 %119 }
  0x7d   :  { %vm166_vm11 = vcmp.eq.s32.totalorder %v732_v34, %v120_v28 }
  0x83   :  { %v727_v29 = vpop.permute.xlu2 %161  ;;  %v129_v30 = vpop.permute.xlu1 %128  ;;  %302 = vperm.xlu2 %545, %v680_v18  }
  0x84   :  { %299 = vperm.xlu1 %544, %v682_v19   ;;  %547 = vset.pattern.permute.xlu0 %v607_v31  ;;  %v123_v32 = vpop.permute.xlu0 %122 }
  0x85   :  { %346 = vperm.xlu0 %547, %v649_v8   ;;  %vm167_vm0 = vcmp.eq.s32.totalorder %v732_v34, %v123_v32 }
  0x8b   :  { %v735_v35 = vpop.permute.xlu1 %140  ;;  %546 = vset.pattern.permute.xlu2 %v607_v31 }
  0x8c   :  { %308 = vperm.xlu1 %544, %v687_v20   ;;  %v138_v36 = vpop.permute.xlu0 %137  ;;  %v187_v37 = vpop.permute.xlu2 %186  ;;  %343 = vperm.xlu2 %546, %v640_v5  }
  0x8d   :  { %vm231_vm1 = vcmp.eq.s32.totalorder %v732_v34, %v187_v37  ;;  %361 = vperm.xlu0 %547, %v661_v12   ;;  %vm172_vm6 = vcmp.eq.s32.totalorder %v732_v34, %v138_v36 }
  0x8e   :  { %vm741_vm2 = vmor %vm167_vm0, %vm231_vm1  ;;  %vm169_vm1 = vcmp.eq.s32.totalorder %v732_v34, %v129_v30 }
  0x93   :  { %v745_v39 = vpop.permute.xlu1 %149 }
  0x94   :  { %548 = vset.pattern.permute.xlu1 %v607_v31  ;;  %v147_v40 = vpop.permute.xlu0 %146  ;;  %v196_v41 = vpop.permute.xlu2 %195  ;;  %352 = vperm.xlu2 %546, %v647_v7   ;;  %v73_v31 = vld [vmem:[#allocation2 + $0x28] sm:$0xff] }
  0x95   :  { %vm234_vm4 = vcmp.eq.s32.totalorder %v732_v34, %v196_v41  ;;  %349 = vperm.xlu1 %548, %v638_v4   ;;  %370 = vperm.xlu0 %547, %v670_v15   ;;  %vm175_vm9 = vcmp.eq.s32.totalorder %v732_v34, %v147_v40  ;;  %v1044_v4 = vmov 0  ;;  %v74_v41 = vld [vmem:[#allocation2 + $0x30] sm:$0xff] }
  0x96   :  { %vm752_vm5 = vmor %vm170_vm3, %vm234_vm4 }
  0x9b   :  { %v756_v43 = vpop.permute.xlu1 %158 }
  0x9c   :  { %v156_v44 = vpop.permute.xlu0 %155  ;;  %v202_v45 = vpop.permute.xlu2 %201  ;;  %358 = vperm.xlu2 %546, %v645_v6  }
  0x9d   :  { %vm236_vm7 = vcmp.eq.s32.totalorder %v732_v34, %v202_v45  ;;  %355 = vperm.xlu1 %548, %v636_v3   ;;  %379 = vperm.xlu0 %547, %v682_v19   ;;  %vm178_vm15 = vcmp.eq.s32.totalorder %v732_v34, %v156_v44  ;;  %v1042_v3 = vmov 0  ;;  %v70_v44 = vld [vmem:[#allocation2 + $0x10] sm:$0xff] }
  0x9e   :  { %vm763_vm8 = vmor %vm172_vm6, %vm236_vm7  ;;  %vm168_vm7 = vcmp.eq.s32.totalorder %v732_v34, %v722_v27 }
  0xa4   :  { %v165_v47 = vpop.permute.xlu0 %164  ;;  %v211_v48 = vpop.permute.xlu2 %210  ;;  %367 = vperm.xlu2 %546, %v657_v10   ;;  %v1050_v10 = vmov 0 }
  0xa5   :  { %vm239_vm10 = vcmp.eq.s32.totalorder %v732_v34, %v211_v48  ;;  %364 = vperm.xlu1 %548, %v659_v11   ;;  %v184_v49 = vpop.permute.xlu1 %183  ;;  %388 = vperm.xlu0 %547, %v687_v20  }
  0xa6   :  { %vm773_vm12 = vmor %vm175_vm9, %vm239_vm10  ;;  %vm230_vm13 = vcmp.eq.s32.totalorder %v732_v34, %v184_v49 }
  0xa7   :  { %vm778_vm14 = vmor %vm166_vm11, %vm230_vm13  ;;  %vm181_vm11 = vcmp.eq.s32.totalorder %v732_v34, %v165_v47  ;;  %v77_v47 = vld [vmem:[#allocation2 + $0x48] sm:$0xff] }
  0xac   :  { %v220_v52 = vpop.permute.xlu2 %219  ;;  %376 = vperm.xlu2 %546, %v666_v13  }
  0xad   :  { %vm242_vm0 = vcmp.eq.s32.totalorder %v732_v34, %v220_v52  ;;  %373 = vperm.xlu1 %548, %v668_v14   ;;  %v193_v53 = vpop.permute.xlu1 %192  ;;  %v190_v54 = vpop.permute.xlu0 %189  ;;  %v1052_v14 = vmov 0 }
  0xae   :  { %vm787_vm3 = vmor %vm178_vm15, %vm242_vm0  ;;  %vm233_vm4 = vcmp.eq.s32.totalorder %v732_v34, %v193_v53  ;;  %vm232_vm6 = vcmp.eq.s32.totalorder %v732_v34, %v190_v54  ;;  %vm171_vm15 = vcmp.eq.s32.totalorder %v732_v34, %v710_v24  ;;  %v68_v54 = vld [vmem:[#allocation2] sm:$0xff] }
  0xaf   :  { %v1031_v55 = vsel %vm787_vm3, 4294967295, %v1030_v55  ;;  %vm795_vm9 = vmor %vm169_vm1, %vm233_vm4 }
  0xb0   :  { %v1033_v56 = vsel %vm795_vm9, 4294967295, %v1032_v56  ;;  %vm799_vm10 = vmor %vm168_vm7, %vm232_vm6  ;;  %vm173_vm6 = vcmp.eq.s32.totalorder %v732_v34, %v735_v35 }
  0xb4   :  { %v229_v58 = vpop.permute.xlu2 %228  ;;  %385 = vperm.xlu2 %546, %v678_v17  }
  0xb5   :  { %vm245_vm13 = vcmp.eq.s32.totalorder %v732_v34, %v229_v58  ;;  %382 = vperm.xlu1 %548, %v680_v18   ;;  %v199_v59 = vpop.permute.xlu1 %198  ;;  %v205_v60 = vpop.permute.xlu0 %204  ;;  %v72_v58 = vld [vmem:[#allocation2 + $0x20] sm:$0xff] }
  0xb6   :  { %vm809_vm0 = vmor %vm181_vm11, %vm245_vm13  ;;  %vm235_vm1 = vcmp.eq.s32.totalorder %v732_v34, %v199_v59  ;;  %vm237_vm4 = vcmp.eq.s32.totalorder %v732_v34, %v205_v60  ;;  %vm174_vm11 = vcmp.eq.s32.totalorder %v732_v34, %v715_v25 }
  0xb7   :  { %v1037_v61 = vsel %vm809_vm0, 4294967295, %v1036_v61  ;;  %vm817_vm7 = vmor %vm171_vm15, %vm235_vm1  ;;  %vm176_vm15 = vcmp.eq.s32.totalorder %v732_v34, %v745_v39 }
  0xb8   :  { %vm821_vm9 = vmor %vm173_vm6, %vm237_vm4 }
  0xb9   :  { %v1041_v63 = vsel %vm821_vm9, 4294967295, %v1040_v63 }
  0xbd   :  { %v208_v0 = vpop.permute.xlu1 %207  ;;  %v214_v1 = vpop.permute.xlu0 %213 }
  0xbe   :  { %vm238_vm13 = vcmp.eq.s32.totalorder %v732_v34, %v208_v0  ;;  %vm240_vm0 = vcmp.eq.s32.totalorder %v732_v34, %v214_v1  ;;  %v270_v2 = vpop.permute.xlu2 %269 }
  0xbf   :  { %vm831_vm1 = vmor %vm174_vm11, %vm238_vm13  ;;  %vm312_vm4 = vcmp.eq.s32.totalorder %v732_v34, %v270_v2  ;;  %vm177_vm11 = vcmp.eq.s32.totalorder %v732_v34, %v720_v26 }
  0xc0   :  { %v1043_v3 = vsel %vm831_vm1, 4294967295, %v1042_v3  ;;  %vm836_vm6 = vmor %vm176_vm15, %vm240_vm0  ;;  %vm179_vm0 = vcmp.eq.s32.totalorder %v732_v34, %v756_v43 }
  0xc1   :  { %v1045_v4 = vsel %vm836_vm6, 4294967295, %v1044_v4  ;;  %vm842_vm9 = vmor %vm799_vm10, %vm312_vm4  ;;  %vm180_vm4 = vcmp.eq.s32.totalorder %v732_v34, %v727_v29 }
  0xc5   :  { %v217_v6 = vpop.permute.xlu1 %216  ;;  %v223_v7 = vpop.permute.xlu0 %222 }
  0xc6   :  { %vm241_vm13 = vcmp.eq.s32.totalorder %v732_v34, %v217_v6  ;;  %vm243_vm3 = vcmp.eq.s32.totalorder %v732_v34, %v223_v7  ;;  %v850_v8 = vpop.permute.xlu2 %275  ;;  %v71_v7 = vld [vmem:[#allocation2 + $0x18] sm:$0xff] }
  0xc7   :  { %vm854_vm15 = vmor %vm177_vm11, %vm241_vm13 }
  0xc8   :  { %vm858_vm10 = vmor %vm179_vm0, %vm243_vm3 }
  0xc9   :  { %v1051_v10 = vsel %vm858_vm10, 4294967295, %v1050_v10 }
  0xcd   :  { %v226_v11 = vpop.permute.xlu1 %225 }
  0xce   :  { %vm244_vm6 = vcmp.eq.s32.totalorder %v732_v34, %v226_v11  ;;  %v865_v12 = vpop.permute.xlu2 %284  ;;  %v264_v13 = vpop.permute.xlu0 %263 }
  0xcf   :  { %vm867_vm1 = vmor %vm180_vm4, %vm244_vm6 }
  0xd0   :  { %v1053_v14 = vsel %vm867_vm1, 4294967295, %v1052_v14 }
  0xd6   :  { %v871_v15 = vpop.permute.xlu2 %293  ;;  %v267_v16 = vpop.permute.xlu1 %266 }
  0xd7   :  { %vm311_vm3 = vcmp.eq.s32.totalorder %v732_v34, %v267_v16  ;;  %v279_v17 = vpop.permute.xlu0 %278 }
  0xd8   :  { %vm315_vm11 = vcmp.eq.s32.totalorder %v732_v34, %v279_v17  ;;  %vm877_vm13 = vmor %vm741_vm2, %vm311_vm3 }
  0xd9   :  { %vm883_vm6 = vmor %vm817_vm7, %vm315_vm11 }
  0xde   :  { %v887_v20 = vpop.permute.xlu2 %302  ;;  %v889_v21 = vpop.permute.xlu1 %272 }
  0xdf   :  { %v288_v22 = vpop.permute.xlu0 %287 }
  0xe6   :  { %v282_v23 = vpop.permute.xlu1 %281  ;;  %v344_v24 = vpop.permute.xlu2 %343 }
  0xe7   :  { %v891_v25 = vpop.permute.xlu0 %296  ;;  %vm316_vm3 = vcmp.eq.s32.totalorder %v732_v34, %v282_v23 }
  0xe8   :  { %vm332_vm1 = vmor %vm763_vm8, %vm316_vm3  ;;  %vm318_vm3 = vcmp.eq.s32.totalorder %v732_v34, %v288_v22  ;;  %v83_v22 = vld [vmem:[#allocation2 + $0x78] sm:$0xff] }
  0xee   :  { %v291_v26 = vpop.permute.xlu1 %290  ;;  %v893_v27 = vpop.permute.xlu2 %352 }
  0xef   :  { %v895_v28 = vpop.permute.xlu0 %305  ;;  %vm319_vm10 = vcmp.eq.s32.totalorder %v732_v34, %v291_v26  ;;  %v78_v26 = vld [vmem:[#allocation2 + $0x50] sm:$0xff] }
  0xf6   :  { %v300_v29 = vpop.permute.xlu1 %299  ;;  %v359_v30 = vpop.permute.xlu2 %358 }
  0xf7   :  { %vm395_vm2 = vcmp.eq.s32.totalorder %v732_v34, %v359_v30  ;;  %v347_v32 = vpop.permute.xlu0 %346 }
  0xf8   :  { %vm391_vm7 = vcmp.eq.s32.totalorder %v732_v34, %v347_v32  ;;  %vm411_vm0 = vmor %vm883_vm6, %vm395_vm2 }
  0xf9   :  { %v427_v35 = vsel %vm411_vm0, %v73_v31, 0.0  ;;  %vm407_vm4 = vmor %vm877_vm13, %vm391_vm7  ;;  %vm314_vm0 = vcmp.eq.s32.totalorder %v732_v34, %v850_v8 }
  0xfa   :  { %v423_v36 = vsel %vm407_vm4, %v69_v33, 0.0  ;;  %vm335_vm13 = vmor %vm773_vm12, %vm319_vm10  ;;  %vm310_vm4 = vcmp.eq.s32.totalorder %v732_v34, %v264_v13  ;;  %vm390_vm10 = vcmp.eq.s32.totalorder %v732_v34, %v344_v24  ;;  %v75_v13 = vld [vmem:[#allocation2 + $0x38] sm:$0xff] }
  0xfb   :  { %v445_v37 = vadd.f32 %v427_v35, %v423_v36  ;;  %vm924_vm12 = vmor %vm752_vm5, %vm314_vm0  ;;  %vm322_vm5 = vcmp.eq.s32.totalorder %v732_v34, %v300_v29 }
  0xfe   :  { %v903_v38 = vpop.permute.xlu1 %308  ;;  %v368_v40 = vpop.permute.xlu2 %367 }
  0xff   :  { %v362_v39 = vpop.permute.xlu0 %361 }
 0x100   :  { %vm396_vm11 = vcmp.eq.s32.totalorder %v732_v34, %v362_v39 }
 0x101   :  { %vm412_vm6 = vmor %vm332_vm1, %vm396_vm11  ;;  %vm398_vm11 = vcmp.eq.s32.totalorder %v732_v34, %v368_v40 }
 0x102   :  { %v428_v46 = vsel %vm412_vm6, %v74_v41, 0.0  ;;  %vm1060_vm6 = vnez %v1043_v3  ;;  %v80_v3 = vld [vmem:[#allocation2 + $0x60] sm:$0xff] }
 0x106   :  { %v377_v51 = vpop.permute.xlu2 %376 }
 0x107   :  { %v350_v43 = vpop.permute.xlu1 %349  ;;  %v371_v45 = vpop.permute.xlu0 %370 }
 0x108   :  { %vm392_vm2 = vcmp.eq.s32.totalorder %v732_v34, %v350_v43  ;;  %vm399_vm7 = vcmp.eq.s32.totalorder %v732_v34, %v371_v45 }
 0x109   :  { %vm408_vm8 = vmor %vm842_vm9, %vm392_vm2 }
 0x10a   :  { %v424_v48 = vsel %vm408_vm8, %v70_v44, 0.0  ;;  %vm415_vm1 = vmor %vm335_vm13, %vm399_vm7  ;;  %vm317_vm8 = vcmp.eq.s32.totalorder %v732_v34, %v865_v12 }
 0x10b   :  { %v920_v49 = vadd.f32 %v428_v46, %v424_v48  ;;  %v431_v50 = vsel %vm415_vm1, %v77_v47, 0.0  ;;  %vm326_vm9 = vmor %vm778_vm14, %vm310_vm4  ;;  %vm313_vm1 = vcmp.eq.s32.totalorder %v732_v34, %v889_v21 }
 0x10c   :  { %v929_v53 = vadd.f32 %v445_v37, %v431_v50  ;;  %vm334_vm13 = vmor %vm1060_vm6, %vm318_vm3  ;;  %vm1065_vm3 = vnez %v1031_v55  ;;  %vm1066_vm6 = vnez %v1041_v63 }
 0x10d   :  { %vm936_vm2 = vmor %vm326_vm9, %vm390_vm10  ;;  %vm321_vm9 = vcmp.eq.s32.totalorder %v732_v34, %v891_v25 }
 0x10e   :  { %vm941_vm7 = vmor %vm334_vm13, %vm398_vm11  ;;  %v422_v0 = vsel %vm936_vm2, %v68_v54, 0.0  ;;  %vm1069_vm2 = vnez %v1033_v56  ;;  %v386_v18 = vpop.permute.xlu2 %385 }
 0x10f   :  { %v356_v42 = vpop.permute.xlu1 %355  ;;  %v380_v59 = vpop.permute.xlu0 %379  ;;  %vm338_vm10 = vmor %vm1065_vm3, %vm322_vm5  ;;  %v430_v55 = vsel %vm941_vm7, %v76_v62, 0.0 }
 0x110   :  { %vm394_vm14 = vcmp.eq.s32.totalorder %v732_v34, %v356_v42  ;;  %vm402_vm0 = vcmp.eq.s32.totalorder %v732_v34, %v380_v59  ;;  %vm961_vm13 = vmor %vm1066_vm6, %vm317_vm8 }
 0x111   :  { %vm410_vm4 = vmor %vm924_vm12, %vm394_vm14  ;;  %vm393_vm12 = vcmp.eq.s32.totalorder %v732_v34, %v893_v27  ;;  %vm401_vm14 = vcmp.eq.s32.totalorder %v732_v34, %v377_v51  ;;  %v82_v27 = vld [vmem:[#allocation2 + $0x70] sm:$0xff] }
 0x112   :  { %v426_v1 = vsel %vm410_vm4, %v72_v58, 0.0  ;;  %vm418_vm11 = vmor %vm338_vm10, %vm402_vm0  ;;  %vm325_vm4 = vcmp.eq.s32.totalorder %v732_v34, %v903_v38  ;;  %vm1074_vm10 = vnez %v1037_v61 }
 0x113   :  { %v442_v2 = vadd.f32 %v426_v1, %v422_v0  ;;  %vm329_vm5 = vmor %vm1069_vm2, %vm313_vm1  ;;  %v434_v63 = vsel %vm418_vm11, %v80_v3, 0.0  ;;  %vm320_vm11 = vcmp.eq.s32.totalorder %v732_v34, %v871_v15  ;;  %vm1075_vm2 = vnez %v1045_v4 }
 0x114   :  { %vm337_vm0 = vmor %vm854_vm15, %vm321_vm9 }
 0x115   :  { %v443_v6 = vadd.f32 %v442_v2, %v430_v55  ;;  %vm974_vm8 = vmor %vm329_vm5, %vm393_vm12  ;;  %vm324_vm12 = vcmp.eq.s32.totalorder %v732_v34, %v895_v28 }
 0x116   :  { %vm980_vm7 = vmor %vm337_vm0, %vm401_vm14  ;;  %v425_v17 = vsel %vm974_vm8, %v71_v7, 0.0  ;;  %vm1076_vm14 = vnez %v1053_v14  ;;  %v81_v14 = vld [vmem:[#allocation2 + $0x68] sm:$0xff] }
 0x117   :  { %v444_v11 = vadd.f32 %v443_v6, %v434_v63  ;;  %v365_v12 = vpop.permute.xlu1 %364  ;;  %v389_v56 = vpop.permute.xlu0 %388  ;;  %vm341_vm9 = vmor %vm1074_vm10, %vm325_vm4  ;;  %v433_v23 = vsel %vm980_vm7, %v79_v9, 0.0  ;;  %vm323_vm7 = vcmp.eq.s32.totalorder %v732_v34, %v887_v20 }
 0x118   :  { %vm397_vm1 = vcmp.eq.s32.totalorder %v732_v34, %v365_v12  ;;  %vm405_vm15 = vcmp.eq.s32.totalorder %v732_v34, %v389_v56  ;;  %vm336_vm5 = vmor %vm1075_vm2, %vm320_vm11 }
 0x119   :  { %vm413_vm3 = vmor %vm961_vm13, %vm397_vm1  ;;  %458 = vst [vmem:[#allocation5] sm:$0xff] %v444_v11  ;;  %vm404_vm13 = vcmp.eq.s32.totalorder %v732_v34, %v386_v18 }
 0x11a   :  { %v429_v19 = vsel %vm413_vm3, %v75_v13, 0.0  ;;  %vm421_vm6 = vmor %vm341_vm9, %vm405_vm15  ;;  %vm1077_vm15 = vnez %v1051_v10 }
 0x11b   :  { %v451_v21 = vadd.f32 %v429_v19, %v425_v17  ;;  %v437_v61 = vsel %vm421_vm6, %v83_v22, 0.0  ;;  %vm340_vm0 = vmor %vm1076_vm14, %vm324_vm12 }
 0x11c   :  { %vm420_vm8 = vmor %vm340_vm0, %vm404_vm13 }
 0x11d   :  { %v452_v24 = vadd.f32 %v451_v21, %v433_v23  ;;  %v436_v30 = vsel %vm420_vm8, %v82_v27, 0.0  ;;  %vm339_vm3 = vmor %vm1077_vm15, %vm323_vm7 }
 0x11f   :  { %v453_v15 = vadd.f32 %v452_v24, %v437_v61  ;;  %v374_v25 = vpop.permute.xlu1 %373 }
 0x120   :  { %vm400_vm4 = vcmp.eq.s32.totalorder %v732_v34, %v374_v25 }
 0x121   :  { %vm416_vm1 = vmor %vm336_vm5, %vm400_vm4  ;;  %461 = vst [vmem:[#allocation5 + $0x18] sm:$0xff] %v453_v15 }
 0x122   :  { %v432_v28 = vsel %vm416_vm1, %v78_v26, 0.0 }
 0x123   :  { %v449_v29 = vadd.f32 %v920_v49, %v432_v28 }
 0x125   :  { %v450_v4 = vadd.f32 %v449_v29, %v436_v30 }
 0x127   :  { %v383_v31 = vpop.permute.xlu1 %382  ;;  %460 = vst [vmem:[#allocation5 + $0x10] sm:$0xff] %v450_v4 }
 0x128   :  { %vm403_vm10 = vcmp.eq.s32.totalorder %v732_v34, %v383_v31 }
 0x129   :  { %vm419_vm9 = vmor %vm339_vm3, %vm403_vm10 }
 0x12a   :  { %v435_v32 = vsel %vm419_vm9, %v81_v14, 0.0 }
 0x12b   :  { %v447_v33 = vadd.f32 %v929_v53, %v435_v32 }
 0x12d   :  { %459 = vst [vmem:[#allocation5 + $0x8] sm:$0xff] %v447_v33 }
 0x12e   :  { %474 = dma.vmem_to_hbm [thread:$0]  %s467_s23, 512, %s469_s26, [#allocation4], %s602_s14, %s602_s14, %s603_s15  }
 0x12f   :  { %599 = dma.done.wait [#allocation4], 512  }
 0x130   :  { %600 = vsyncadd [#allocation4], 4294966784 }
 0x131   :  { %479 = vsyncpa [#allocation3], 1 }
 0x132   :  { %480 = vsyncpa [#allocation4], 1 }

</bundles_post_ra>
